<compile_context>
chip_gen: v6e
topology: v6e:2x2x1
jax: 0.10.0
libtpu: 0.0.40
codegen_flags: <defaults>
</compile_context>

<pallas_src>
import functools

import jax
import jax.numpy as jnp
from jax.experimental import pallas as pl
from jax.experimental.pallas import tpu as pltpu


def _round_up(x, m):
    return (x + m - 1) // m * m


def _rbm_forward_kernel(v_ref, w_ref, hb_ref, vb_ref, u_ref,
                        vprob_ref, hprob_ref):
    # MXU inputs in bf16; accumulation and elementwise math in f32.
    v = v_ref[...].astype(jnp.bfloat16)          # [tb, V]
    w = w_ref[...]                               # [V, H]  (bf16, VMEM-resident)

    # --- hidden activations: sigmoid(v @ W + h_bias) ----------------------
    pre_h = jnp.dot(v, w, preferred_element_type=jnp.float32) + hb_ref[...]
    h_prob = jax.nn.sigmoid(pre_h)               # [tb, H] f32

    # --- Bernoulli sample of hidden units (uniforms streamed per tile) ----
    h = (u_ref[...] < h_prob).astype(jnp.bfloat16)   # exact 0/1 values

    # --- visible reconstruction: sigmoid(h @ W.T + v_bias) ----------------
    # Contract on W's last (hidden) dim -- no transposed W copy materialized.
    pre_v = jax.lax.dot_general(
        h, w,
        dimension_numbers=(((1,), (1,)), ((), ())),
        preferred_element_type=jnp.float32) + vb_ref[...]
    v_prob = jax.nn.sigmoid(pre_v)               # [tb, V] f32

    vprob_ref[...] = v_prob
    hprob_ref[...] = h_prob


@functools.partial(jax.jit, static_argnames=("batch_tile",))
def rbm_forward(v, W, v_bias, h_bias, key, *, batch_tile=128):
    """RBM.forward: returns (v_prob, h_prob). `key` drives the Bernoulli draw."""
    B, n_visible = v.shape
    n_hidden = W.shape[1]

    # Batch tile: fill the MXU for real batches; pad tiny batches to a sublane
    # multiple.  128 is a solid default across v5e/v6e/v7x.
    tb = batch_tile if B >= batch_tile else _round_up(B, 8)
    B_pad = _round_up(B, tb)
    grid = (B_pad // tb,)

    v_pad = jnp.zeros((B_pad, n_visible), jnp.float32).at[:B].set(
        v.astype(jnp.float32))
    # Uniforms for the Bernoulli sample (== torch.rand_like(h_prob)).
    u = jax.random.uniform(key, (B_pad, n_hidden), dtype=jnp.float32)

    w_bf16 = W.astype(jnp.bfloat16)
    hb = h_bias.reshape(1, n_hidden).astype(jnp.float32)
    vb = v_bias.reshape(1, n_visible).astype(jnp.float32)

    # VMEM estimate: W (2 buffers, bf16) + double-buffered f32 activation tiles
    # + biases + headroom.  Clamp to a v7x-safe ceiling.
    vmem_est = (2 * n_visible * n_hidden * 2
                + 2 * 2 * tb * (2 * n_visible + 2 * n_hidden) * 4 // 2
                + 2 * 4 * (n_visible + n_hidden)
                + (4 << 20))
    vmem_limit = int(min(max(vmem_est, 32 << 20), 96 << 20))

    v_prob, h_prob = pl.pallas_call(
        _rbm_forward_kernel,
        out_shape=(
            jax.ShapeDtypeStruct((B_pad, n_visible), jnp.float32),
            jax.ShapeDtypeStruct((B_pad, n_hidden), jnp.float32),
        ),
        grid=grid,
        in_specs=[
            pl.BlockSpec((tb, n_visible), lambda i: (i, 0)),        # v tile
            pl.BlockSpec((n_visible, n_hidden), lambda i: (0, 0)),  # W (resident)
            pl.BlockSpec((1, n_hidden), lambda i: (0, 0)),          # h_bias row
            pl.BlockSpec((1, n_visible), lambda i: (0, 0)),         # v_bias row
            pl.BlockSpec((tb, n_hidden), lambda i: (i, 0)),         # uniforms
        ],
        out_specs=(
            pl.BlockSpec((tb, n_visible), lambda i: (i, 0)),
            pl.BlockSpec((tb, n_hidden), lambda i: (i, 0)),
        ),
        compiler_params=pltpu.CompilerParams(
            dimension_semantics=("parallel",),
            vmem_limit_bytes=vmem_limit,
        ),
    )(v_pad, w_bf16, hb, vb, u)

    return v_prob[:B], h_prob[:B]


def init_rbm_params(key, n_visible, n_hidden):
    # torch.nn.init.xavier_uniform_: U(-a, a), a = sqrt(6 / (fan_in + fan_out))
    bound = (6.0 / (n_visible + n_hidden)) ** 0.5
    W = jax.random.uniform(key, (n_visible, n_hidden),
                           minval=-bound, maxval=bound, dtype=jnp.float32)
    v_bias = jnp.zeros((n_visible,), dtype=jnp.float32)
    h_bias = jnp.zeros((n_hidden,), dtype=jnp.float32)
    return W, v_bias, h_bias


if __name__ == "__main__":
    key = jax.random.PRNGKey(0)
    k_w, k_v, k_s = jax.random.split(key, 3)

    B = 8
    n_visible = 256
    n_hidden = 128

    W, v_bias, h_bias = init_rbm_params(k_w, n_visible, n_hidden)
    # binary-ish visible input, as is typical for an RBM
    v = (jax.random.uniform(k_v, (B, n_visible)) < 0.5).astype(jnp.float32)

    v_prob, h_prob = rbm_forward(v, W, v_bias, h_bias, k_s)
    jax.block_until_ready((v_prob, h_prob))

    assert v_prob.shape == (B, n_visible) and h_prob.shape == (B, n_hidden)
    assert bool(jnp.all((v_prob > 0.0) & (v_prob < 1.0)))
    assert bool(jnp.all((h_prob > 0.0) & (h_prob < 1.0)))

    # Reference check of the deterministic half with the same bf16 MXU inputs.
    ref_h = jax.nn.sigmoid(
        jnp.dot(v.astype(jnp.bfloat16), W.astype(jnp.bfloat16),
                preferred_element_type=jnp.float32) + h_bias)
    assert bool(jnp.max(jnp.abs(h_prob - ref_h)) < 5e-3)

    print("KERNEL_OK")
</pallas_src>

<mosaic_0001>
module attributes {stable_mosaic.version = 11 : i64} {
  func.func @_rbm_forward_kernel(%arg0: i32, %arg1: memref<8x256xf32, #tpu.memory_space<vmem>>, %arg2: memref<256x128xbf16, #tpu.memory_space<vmem>>, %arg3: memref<1x128xf32, #tpu.memory_space<vmem>>, %arg4: memref<1x256xf32, #tpu.memory_space<vmem>>, %arg5: memref<8x128xf32, #tpu.memory_space<vmem>>, %arg6: memref<8x256xf32, #tpu.memory_space<vmem>>, %arg7: memref<8x128xf32, #tpu.memory_space<vmem>>) attributes {dimension_semantics = [#tpu.dimension_semantics<parallel>], iteration_bounds = array<i64: 1>, scalar_prefetch = 0 : i64, scratch_operands = 0 : i64, tpu.core_type = #tpu.core_type<tc>, window_params = [{transform_indices = @transform_0, window_bounds = array<i64: 8, 256>}, {pipeline_mode = #tpu.pipeline_mode<synchronous>, transform_indices = @transform_1, window_bounds = array<i64: 256, 128>}, {pipeline_mode = #tpu.pipeline_mode<synchronous>, transform_indices = @transform_2, window_bounds = array<i64: 1, 128>}, {pipeline_mode = #tpu.pipeline_mode<synchronous>, transform_indices = @transform_3, window_bounds = array<i64: 1, 256>}, {transform_indices = @transform_4, window_bounds = array<i64: 8, 128>}, {transform_indices = @transform_5, window_bounds = array<i64: 8, 256>}, {transform_indices = @transform_6, window_bounds = array<i64: 8, 128>}]} {
    %c0 = arith.constant 0 : index
    %c0_0 = arith.constant 0 : index
    %0 = vector.load %arg1[%c0, %c0_0] : memref<8x256xf32, #tpu.memory_space<vmem>>, vector<8x256xf32>
    %1 = arith.truncf %0 : vector<8x256xf32> to vector<8x256xbf16>
    %c0_1 = arith.constant 0 : index
    %c0_2 = arith.constant 0 : index
    %2 = vector.load %arg2[%c0_1, %c0_2] : memref<256x128xbf16, #tpu.memory_space<vmem>>, vector<256x128xbf16>
    %cst = arith.constant dense<0.000000e+00> : vector<8x128xf32>
    %3 = tpu.matmul %1, %2, %cst {dimension_numbers = #tpu.dot_dimension_numbers<[1], [0], [0], [1], [0, 0, 1, 1], [], []>} : vector<8x256xbf16>, vector<256x128xbf16>, vector<8x128xf32> -> vector<8x128xf32>
    %c0_3 = arith.constant 0 : index
    %c0_4 = arith.constant 0 : index
    %4 = vector.load %arg3[%c0_3, %c0_4] : memref<1x128xf32, #tpu.memory_space<vmem>>, vector<1x128xf32>
    %5 = vector.broadcast %4 : vector<1x128xf32> to vector<8x128xf32>
    %6 = arith.addf %3, %5 : vector<8x128xf32>
    %7 = arith.negf %6 : vector<8x128xf32>
    %8 = math.exp %7 : vector<8x128xf32>
    %cst_5 = arith.constant 1.000000e+00 : f32
    %9 = vector.broadcast %cst_5 : f32 to vector<8x128xf32>
    %10 = arith.addf %9, %8 : vector<8x128xf32>
    %11 = arith.divf %9, %10 : vector<8x128xf32>
    %c0_6 = arith.constant 0 : index
    %c0_7 = arith.constant 0 : index
    %12 = vector.load %arg5[%c0_6, %c0_7] : memref<8x128xf32, #tpu.memory_space<vmem>>, vector<8x128xf32>
    %13 = arith.cmpf olt, %12, %11 : vector<8x128xf32>
    %14 = arith.extui %13 : vector<8x128xi1> to vector<8x128xi32>
    %15 = arith.sitofp %14 : vector<8x128xi32> to vector<8x128xf32>
    %16 = arith.truncf %15 : vector<8x128xf32> to vector<8x128xbf16>
    %cst_8 = arith.constant dense<0.000000e+00> : vector<8x256xf32>
    %17 = tpu.matmul %16, %2, %cst_8 {dimension_numbers = #tpu.dot_dimension_numbers<[1], [1], [0], [0], [0, 0, 1, 0], [], []>} : vector<8x128xbf16>, vector<256x128xbf16>, vector<8x256xf32> -> vector<8x256xf32>
    %c0_9 = arith.constant 0 : index
    %c0_10 = arith.constant 0 : index
    %18 = vector.load %arg4[%c0_9, %c0_10] : memref<1x256xf32, #tpu.memory_space<vmem>>, vector<1x256xf32>
    %19 = vector.broadcast %18 : vector<1x256xf32> to vector<8x256xf32>
    %20 = arith.addf %17, %19 : vector<8x256xf32>
    %21 = arith.negf %20 : vector<8x256xf32>
    %22 = math.exp %21 : vector<8x256xf32>
    %cst_11 = arith.constant 1.000000e+00 : f32
    %23 = vector.broadcast %cst_11 : f32 to vector<8x256xf32>
    %24 = arith.addf %23, %22 : vector<8x256xf32>
    %25 = arith.divf %23, %24 : vector<8x256xf32>
    %c0_12 = arith.constant 0 : index
    %c0_13 = arith.constant 0 : index
    %26 = vector.load %arg6[%c0_12, %c0_13] : memref<8x256xf32, #tpu.memory_space<vmem>>, vector<8x256xf32>
    tpu.vector_store %arg6[%c0_12, %c0_13], %25 {strides = array<i32>} : memref<8x256xf32, #tpu.memory_space<vmem>>, vector<8x256xf32>,
    %c0_14 = arith.constant 0 : index
    %c0_15 = arith.constant 0 : index
    %27 = vector.load %arg7[%c0_14, %c0_15] : memref<8x128xf32, #tpu.memory_space<vmem>>, vector<8x128xf32>
    tpu.vector_store %arg7[%c0_14, %c0_15], %11 {strides = array<i32>} : memref<8x128xf32, #tpu.memory_space<vmem>>, vector<8x128xf32>,
    return
  }
  func.func @transform_0(%arg0: i32) -> (i32, i32) {
    %c0_i32 = arith.constant 0 : i32
    %c0_i32_0 = arith.constant 0 : i32
    return %arg0, %c0_i32 : i32, i32
  }
  func.func @transform_1(%arg0: i32) -> (i32, i32) {
    %c0_i32 = arith.constant 0 : i32
    %c0_i32_0 = arith.constant 0 : i32
    %c0_i32_1 = arith.constant 0 : i32
    return %c0_i32, %c0_i32_0 : i32, i32
  }
  func.func @transform_2(%arg0: i32) -> (i32, i32) {
    %c0_i32 = arith.constant 0 : i32
    %c0_i32_0 = arith.constant 0 : i32
    %c0_i32_1 = arith.constant 0 : i32
    return %c0_i32, %c0_i32_0 : i32, i32
  }
  func.func @transform_3(%arg0: i32) -> (i32, i32) {
    %c0_i32 = arith.constant 0 : i32
    %c0_i32_0 = arith.constant 0 : i32
    %c0_i32_1 = arith.constant 0 : i32
    return %c0_i32, %c0_i32_0 : i32, i32
  }
  func.func @transform_4(%arg0: i32) -> (i32, i32) {
    %c0_i32 = arith.constant 0 : i32
    %c0_i32_0 = arith.constant 0 : i32
    return %arg0, %c0_i32 : i32, i32
  }
  func.func @transform_5(%arg0: i32) -> (i32, i32) {
    %c0_i32 = arith.constant 0 : i32
    %c0_i32_0 = arith.constant 0 : i32
    return %arg0, %c0_i32 : i32, i32
  }
  func.func @transform_6(%arg0: i32) -> (i32, i32) {
    %c0_i32 = arith.constant 0 : i32
    %c0_i32_0 = arith.constant 0 : i32
    return %arg0, %c0_i32 : i32, i32
  }
}

</mosaic_0001>

<bundles_post_ra>
// kernel: rbm_forward.1
= control target key start
LH: loop header
LB: loop body
LE: loop exit
PB: predicated region body
PF: predicated region fallthrough
CT: control target
= control target key end

     0   :  { %12 = vsyncpa [#allocation3], 0  ;;  %s556_s0 = inlined_call_operand.vmem [shape: f32[8,256], index: 0, kind: input, shape index: {}]   ;;  %s557_s1 = inlined_call_operand.vmem [shape: bf16[256,128], index: 1, kind: input, shape index: {}]   ;;  %s558_s2 = inlined_call_operand.vmem [shape: f32[1,128], index: 2, kind: input, shape index: {}]   ;;  %s559_s3 = inlined_call_operand.vmem [shape: f32[1,256], index: 3, kind: input, shape index: {}]   ;;  %s560_s4 = inlined_call_operand.vmem [shape: f32[8,128], index: 4, kind: input, shape index: {}]   ;;  %s561_s5 = inlined_call_operand.hbm [shape: f32[8,256], index: 5, kind: output, shape index: {0}]   ;;  %s562_s6 = inlined_call_operand.hbm [shape: f32[8,128], index: 6, kind: output, shape index: {1}]  }
   0x1   :  { %v377_v0 = vld [vmem:[%s557_s1 + $0x78] sm:$0xff]   ;;  %v379_v2 = vld [vmem:[%s557_s1 + $0x70] sm:$0xff]   ;;  %v381_v4 = vld [vmem:[%s557_s1 + $0x68] sm:$0xff]  }
   0x2   :  { %v378_v1 = vld [vmem:[%s557_s1 + $0x38] sm:$0xff]   ;;  %334 = vmatprep.subr.bf16.mxu0 %v377_v0  ;;  %356 = vmatprep.subr.bf16.mxu1 %v377_v0  ;;  %v380_v3 = vld [vmem:[%s557_s1 + $0x30] sm:$0xff]   ;;  %v382_v5 = vld [vmem:[%s557_s1 + $0x28] sm:$0xff]  }
   0x3   :  { %335 = vmatpush3.bf16.msra.mxu0 %v378_v1  ;;  %357 = vmatpush3.bf16.xpose.msra.mxu1 %v378_v1  ;;  %v383_v6 = vld [vmem:[%s557_s1 + $0x60] sm:$0xff]   ;;  %v385_v8 = vld [vmem:[%s557_s1 + $0x58] sm:$0xff]   ;;  %v387_v10 = vld [vmem:[%s557_s1 + $0x50] sm:$0xff]  }
   0x4   :  { %336 = vmatprep.subr.bf16.mxu0 %v379_v2  ;;  %358 = vmatprep.subr.bf16.mxu1 %v379_v2  ;;  %v384_v7 = vld [vmem:[%s557_s1 + $0x20] sm:$0xff]   ;;  %v386_v9 = vld [vmem:[%s557_s1 + $0x18] sm:$0xff]   ;;  %v26_v11 = vld [vmem:[%s556_s0 + $0x8] sm:$0xff] }
   0x7   :  { %337 = vmatpush3.bf16.msra.mxu0 %v380_v3 }
   0x8   :  { %338 = vmatprep.subr.bf16.mxu0 %v381_v4 }
   0xb   :  { %339 = vmatpush3.bf16.msra.mxu0 %v382_v5  ;;  %359 = vmatpush3.bf16.xpose.msra.mxu1 %v380_v3 }
   0xc   :  { %340 = vmatprep.subr.bf16.mxu0 %v383_v6  ;;  %360 = vmatprep.subr.bf16.mxu1 %v381_v4 }
   0xf   :  { %341 = vmatpush3.bf16.msra.mxu0 %v384_v7 }
  0x10   :  { %342 = vmatprep.subr.bf16.mxu0 %v385_v8 }
  0x11   :  { %13 = vsyncpa [#allocation5], 0  ;;  %v28_v12 = vpack.c.bf16 %v26_v11, %v26_v11  ;;  %v388_v13 = vld [vmem:[%s557_s1 + $0x10] sm:$0xff]   ;;  %v389_v14 = vld [vmem:[%s557_s1 + $0x48] sm:$0xff]   ;;  %v449_v32 = vmov 1.0|1.0  }
  0x12   :  { %v390_v15 = vld [vmem:[%s557_s1 + $0x8] sm:$0xff]   ;;  %v391_v16 = vld [vmem:[%s557_s1 + $0x40] sm:$0xff]  }
  0x13   :  { %343 = vmatpush3.bf16.msra.mxu0 %v386_v9  ;;  %196 = vmatprep.mubr.bf16.mxu0 %v28_v12  ;;  %v392_v17 = vld [vmem:[%s557_s1] sm:$0xff]  }
  0x14   :  { %344 = vmatprep.subr.bf16.mxu0 %v387_v10  ;;  %361 = vmatpush3.bf16.xpose.msra.mxu1 %v382_v5  ;;  %v25_v18 = vld [vmem:[%s556_s0] sm:$0xff] }
  0x15   :  { %362 = vmatprep.subr.bf16.mxu1 %v383_v6  ;;  %v27_v19 = vpack.c.bf16 %v25_v18, %v25_v18  ;;  %v311_v21 = vld [vmem:[%s558_s2] ss:$0 sm:$0xff]  ;;  %s450_s2 = smov [#allocation4]  }
  0x16   :  { %v210_v30 = vld [vmem:[%s560_s4] sm:$0xff]  ;;  %s299_s11 = sshll.u32 %s450_s2, 4  ;;  %s300_s11 = int_to_ptr.vmem [resolvable:$true] %s299_s11 }
  0x17   :  { %345 = vmatpush3.bf16.msra.mxu0 %v388_v13  ;;  %s405_s12 = scalar_lea.vmem %s300_s11, 128  ;;  %p410_p1 = scmp.lt.s32.totalorder %s300_s11, %s300_s11 }
  0x18   :  { %346 = vmatprep.subr.bf16.mxu0 %v389_v14  ;;  %p406_p0 = scmp.ne.s32.totalorder %s300_s11, %s405_s12  ;;  %p411_p2 = scmp.lt.s32.totalorder %s405_s12, %s405_s12 }
  0x1a   :  { %p412_p3 = por %p411_p2, %p410_p1 }
  0x1b   :  { %347 = vmatpush3.bf16.msra.mxu0 %v390_v15 }
  0x1c   :  { %348 = vmatprep.subr.bf16.mxu0 %v391_v16  ;;  %363 = vmatpush3.bf16.xpose.msra.mxu1 %v384_v7  ;;  %p413_p4 = pnand %p412_p3, %p406_p0 }
  0x1d   :  { %364 = vmatprep.subr.bf16.mxu1 %v385_v8 }
  0x1f   :  { %349 = vmatpush3.bf16.msra.mxu0 %v392_v17 }
  0x22   :  { %197 = vmatmul.mubr.bf16.vlgmr.msra.gmra.mxu0 %v27_v19 }
  0x24   :  { %365 = vmatpush3.bf16.xpose.msra.mxu1 %v386_v9 }
  0x25   :  { %366 = vmatprep.subr.bf16.mxu1 %v387_v10 }
  0x2c   :  { %367 = vmatpush3.bf16.xpose.msra.mxu1 %v388_v13 }
  0x2d   :  { %368 = vmatprep.subr.bf16.mxu1 %v389_v14 }
  0x34   :  { %369 = vmatpush3.bf16.xpose.msra.mxu1 %v390_v15 }
  0x35   :  { %370 = vmatprep.subr.bf16.mxu1 %v391_v16 }
  0x3c   :  { %371 = vmatpush3.bf16.xpose.msra.mxu1 %v392_v17 }
  0xe2   :  { %v350_v20 = vpop.f32.mrf.mxu0 }
  0xe4   :  { %v351_v22 = vpop.f32.mrf.mxu0 }
  0xe5   :  { %v352_v23 = vadd.f32 %v351_v22, %v350_v20 }
  0xe6   :  { %v353_v24 = vpop.f32.mrf.mxu0 }
  0xe7   :  { %v199_v25 = vadd.f32 %v352_v23, %v311_v21 }
  0xe8   :  { %v354_v26 = vpop.f32.mrf.mxu0 }
  0xe9   :  { %v328_v27 = vmul.f32 -1.442695, %v199_v25 }
  0xeb   :  { %393 = vpow2.f32 %v328_v27 }
  0xf8   :  { %v394_v28 = vpop.eup %393 }
  0xf9   :  { %v207_v29 = vadd.f32 1.0, %v394_v28 }
  0xfb   :  { %395 = vrcp.f32 %v207_v29 }
 0x108   :  { %v396_v31 = vpop.eup %395 }
 0x109   :  { %282 = vst [vmem:[#allocation4] sm:$0xff] %v396_v31  ;;  %vm211_vm0 = vcmp.lt.f32.partialorder %v210_v30, %v396_v31 }
 0x10a   :  { %vm330_vm1 = vmpackc.low %vm211_vm0, %vm211_vm0 }
 0x10b   :  { %372 = vmatprep.mubr.msk.bf16.mxu1 %vm330_vm1, %v449_v32 }
 0x10c   :  { %373 = vmatmul.mubr.msk.bf16.vlgmr.msra.gmra.mxu1 %vm330_vm1, %v449_v32 }
 0x10d   :  { %416 = shalt.err (!%p413_p4)
}
 0x10e   :  { %302 = dma.vmem_to_hbm [thread:$0]  %s300_s11, 128, %s562_s6, [#allocation5]   ;;  %v217_v33 = vlaneseq  ;;  %v215_v36 = vld [vmem:[%s559_s3] sm:$0x3] }
 0x10f   :  { %s451_s3 = smov [#allocation2]  }
 0x110   :  { %v218_v34 = vshrl.u32 %v217_v33, 7  ;;  %s289_s6 = sshll.u32 %s451_s3, 4  ;;  %s290_s6 = int_to_ptr.vmem [resolvable:$true] %s289_s6 }
 0x111   :  { %s425_s16 = scalar_lea.vmem %s290_s6, 256  ;;  %p430_p6 = scmp.lt.s32.totalorder %s290_s6, %s290_s6 }
 0x112   :  { %v219_v35 = vsub.s32 0, %v218_v34  ;;  %v223_v37 = vsub.s32 1, %v218_v34  ;;  %p426_p5 = scmp.ne.s32.totalorder %s290_s6, %s425_s16  ;;  %p431_p7 = scmp.lt.s32.totalorder %s425_s16, %s425_s16 }
 0x114   :  { %v220_v38 = vrot.slane %v215_v36, %v219_v35  ;;  %v224_v39 = vrot.slane %v215_v36, %v223_v37  ;;  %p432_p8 = por %p431_p7, %p430_p6 }
 0x116   :  { %p433_p9 = pnand %p432_p8, %p426_p5 }
 0x1cc   :  { %v261_v40 = vpop.f32.mrf.mxu1 }
 0x1cd   :  { %v262_v41 = vadd.f32 %v261_v40, %v220_v38 }
 0x1ce   :  { %v263_v42 = vpop.f32.mrf.mxu1 }
 0x1cf   :  { %v332_v43 = vmul.f32 -1.442695, %v262_v41  ;;  %v264_v44 = vadd.f32 %v263_v42, %v224_v39 }
 0x1d0   :  { %v265_v45 = vpop.f32.mrf.mxu1 }
 0x1d1   :  { %397 = vpow2.f32 %v332_v43  ;;  %v333_v46 = vmul.f32 -1.442695, %v264_v44 }
 0x1d2   :  { %v266_v47 = vpop.f32.mrf.mxu1 }
 0x1d3   :  { %399 = vpow2.f32 %v333_v46 }
 0x1de   :  { %v398_v48 = vpop.eup %397 }
 0x1df   :  { %v274_v49 = vadd.f32 1.0, %v398_v48 }
 0x1e0   :  { %v400_v50 = vpop.eup %399 }
 0x1e1   :  { %v275_v51 = vadd.f32 1.0, %v400_v50  ;;  %401 = vrcp.f32 %v274_v49 }
 0x1e3   :  { %403 = vrcp.f32 %v275_v51 }
 0x1ee   :  { %v402_v52 = vpop.eup %401 }
 0x1ef   :  { %280 = vst [vmem:[#allocation2] sm:$0xff] %v402_v52 }
 0x1f0   :  { %v404_v53 = vpop.eup %403 }
 0x1f1   :  { %281 = vst [vmem:[#allocation2 + $0x8] sm:$0xff] %v404_v53 }
 0x1f2   :  { %436 = shalt.err (!%p433_p9)
}
 0x1f3   :  { %292 = dma.vmem_to_hbm [thread:$0]  %s290_s6, 256, %s561_s5, [#allocation3]  }
 0x1f4   :  { %445 = dma.done.wait [#allocation3], 256  }
 0x1f5   :  { %446 = vsyncadd [#allocation3], 4294967040 }
 0x1f6   :  { %447 = dma.done.wait [#allocation5], 128  }
 0x1f7   :  { %448 = vsyncadd [#allocation5], 4294967168 }
 0x1f8   :  { %309 = vsyncpa [#allocation3], 1 }
 0x1f9   :  { %310 = vsyncpa [#allocation5], 1 }

</bundles_post_ra>
